<compile_context>
chip_gen: v5e
topology: v5e:2x2
jax: 0.10.0
libtpu: 0.0.40
codegen_flags: <defaults>
</compile_context>

<pallas_src>
import functools
import math

import numpy as np

import jax
import jax.numpy as jnp
from jax import lax
from jax.experimental import pallas as pl
from jax.experimental.pallas import tpu as pltpu


def _round_up(a, b):
    return ((a + b - 1) // b) * b


# ----------------------------------------------------------------------------
# Kernel 1: pairwise squared distances (sampled points vs all nodes) + graph mask
# ----------------------------------------------------------------------------
def _dist_kernel(ps_ref, pnt_ref, bs_ref, bn_ref, o_ref):
    # ps : (ts, 3)  sampled positions       pnt: (3, tn) node positions (transposed)
    # bs : (ts, 1)  sampled batch id (i32)  bn : (1, tn) node batch id (i32)
    ps = ps_ref[...]
    pn = pnt_ref[...]
    # Direct (a - b)^2 accumulation on the VPU: no MXU, no |a|^2+|b|^2-2ab cancellation.
    dx = ps[:, 0:1] - pn[0:1, :]
    dy = ps[:, 1:2] - pn[1:2, :]
    dz = ps[:, 2:3] - pn[2:3, :]
    d2 = dx * dx + dy * dy + dz * dz
    same = bs_ref[...] == bn_ref[...]
    o_ref[...] = jnp.where(same, d2, jnp.float32(1e30))


def pairwise_dist2_pallas(pos_s, batch_s, pos_n, batch_n):
    s, n = pos_s.shape[0], pos_n.shape[0]
    # Big lane-dense tiles: output block up to 256 x 2048 f32 (2 MiB), double-buffered
    # footprint ~4 MiB — well inside every generation's VMEM budget.
    ts = min(256, _round_up(max(s, 8), 8))
    tn = min(2048, _round_up(max(n, 128), 128))
    s_pad, n_pad = _round_up(s, ts), _round_up(n, tn)

    ps = jnp.pad(pos_s, ((0, s_pad - s), (0, 0)))
    pnt = jnp.pad(pos_n, ((0, n_pad - n), (0, 0))).T                     # (3, n_pad)
    bs = jnp.pad(batch_s.astype(jnp.int32), (0, s_pad - s),
                 constant_values=-1).reshape(s_pad, 1)
    bn = jnp.pad(batch_n.astype(jnp.int32), (0, n_pad - n),
                 constant_values=-2).reshape(1, n_pad)

    out = pl.pallas_call(
        _dist_kernel,
        out_shape=jax.ShapeDtypeStruct((s_pad, n_pad), jnp.float32),
        grid_spec=pltpu.PrefetchScalarGridSpec(
            num_scalar_prefetch=0,
            grid=(s_pad // ts, n_pad // tn),
            in_specs=[
                pl.BlockSpec((ts, 3), lambda i, j: (i, 0)),
                pl.BlockSpec((3, tn), lambda i, j: (0, j)),
                pl.BlockSpec((ts, 1), lambda i, j: (i, 0)),
                pl.BlockSpec((1, tn), lambda i, j: (0, j)),
            ],
            out_specs=pl.BlockSpec((ts, tn), lambda i, j: (i, j)),
        ),
        compiler_params=pltpu.CompilerParams(
            dimension_semantics=("parallel", "parallel")),
    )(ps, pnt, bs, bn)
    return out[:s, :n]


# ----------------------------------------------------------------------------
# Kernel 2: fused PointConv (per-neighbor-slot MLP + masked max aggregation)
# ----------------------------------------------------------------------------
def _pointconv_kernel(feats_ref, vld_ref, w1_ref, b1_ref, w2_ref, b2_ref, o_ref, *, k):
    # feats: (K, ts, F+3)  cat([x_j, pos_j - pos_i]) per neighbor slot (K-leading layout)
    # vld  : (K, ts, 1)    1.0 = valid neighbor slot
    # w1   : (F+3, Hp) bf16   b1: (1, Hp) f32
    # w2   : (Hp,  Cp) bf16   b2: (1, Cp) f32      (Hp, Cp multiples of 128)
    ts, cp = o_ref.shape
    hp = w1_ref.shape[1]

    w1 = w1_ref[...]
    w2 = w2_ref[...]
    b1 = jnp.broadcast_to(b1_ref[...], (ts, hp))     # hoisted: one broadcast per tile
    neg = jnp.float32(-1e30)

    def body(s, red):
        fj = feats_ref[s].astype(w1.dtype)           # (ts, F+3) — leading-axis slot index
        vj = vld_ref[s]                              # (ts, 1)
        # fused concat is already done in the wrapper -> single layer-1 matmul per slot
        h = jnp.dot(fj, w1, preferred_element_type=jnp.float32)
        h = jnp.maximum(h + b1, 0.0).astype(w2.dtype)
        m = jnp.dot(h, w2, preferred_element_type=jnp.float32)          # (ts, Cp)
        m = jnp.where(vj > 0.5, m, neg)
        return jnp.maximum(red, m)

    red = lax.fori_loop(0, k, body, jnp.full((ts, cp), neg, jnp.float32))
    # b2 is slot-invariant: apply once after the max (every sampled point has >=1 valid
    # neighbor — itself — so max_s(m_s + b2) == max_s(m_s) + b2).
    o_ref[...] = (red + b2_ref[...]).astype(o_ref.dtype)


def point_conv_pallas(x_nbr, rel, valid, padded_params, *, c_out):
    # x_nbr: [S, K, F], rel: [S, K, 3], valid: [S, K] (bool)
    w1, b1, w2, b2 = padded_params
    s, k, f = x_nbr.shape
    fp3 = f + 3
    hp, cp = w1.shape[1], w2.shape[1]

    ts = min(128, _round_up(max(s, 8), 8))           # ts=128: no vreg spill pressure
    s_pad = _round_up(s, ts)

    # Fuse the torch.cat in the wrapper and relayout K-leading so per-slot access inside
    # the kernel is a free leading-axis index (no lane-offset slices).
    feats = jnp.concatenate([x_nbr, rel], axis=-1)                       # (S, K, F+3)
    feats = jnp.transpose(feats, (1, 0, 2))                              # (K, S, F+3)
    feats = jnp.pad(feats, ((0, 0), (0, s_pad - s), (0, 0)))
    vld = jnp.transpose(valid.astype(jnp.float32), (1, 0))[:, :, None]   # (K, S, 1)
    vld = jnp.pad(vld, ((0, 0), (0, s_pad - s), (0, 0)))

    kernel = functools.partial(_pointconv_kernel, k=k)
    out = pl.pallas_call(
        kernel,
        out_shape=jax.ShapeDtypeStruct((s_pad, cp), jnp.float32),
        grid_spec=pltpu.PrefetchScalarGridSpec(
            num_scalar_prefetch=0,
            grid=(s_pad // ts,),
            in_specs=[
                pl.BlockSpec((k, ts, fp3), lambda i: (0, i, 0)),
                pl.BlockSpec((k, ts, 1), lambda i: (0, i, 0)),
                pl.BlockSpec((fp3, hp), lambda i: (0, 0)),
                pl.BlockSpec((1, hp), lambda i: (0, 0)),
                pl.BlockSpec((hp, cp), lambda i: (0, 0)),
                pl.BlockSpec((1, cp), lambda i: (0, 0)),
            ],
            out_specs=pl.BlockSpec((ts, cp), lambda i: (i, 0)),   # lane-dense (cp % 128 == 0)
        ),
        compiler_params=pltpu.CompilerParams(
            dimension_semantics=("parallel",)),
    )(feats, vld, w1, b1, w2, b2)
    return out[:s, :c_out]


# ----------------------------------------------------------------------------
# JAX glue: fps, neighbor selection, parameter prep
# ----------------------------------------------------------------------------
def _fps_one(pos_g, n_sample):
    """Deterministic farthest-point sampling of one graph (start at node 0)."""
    big = jnp.float32(1e30)
    sel0 = jnp.zeros((n_sample,), jnp.int32)
    mind0 = jnp.full((pos_g.shape[0],), big, jnp.float32)

    def body(t, carry):
        mind, sel = carry
        last = pos_g[sel[t - 1]]
        d = jnp.sum((pos_g - last[None, :]) ** 2, axis=1)
        mind = jnp.minimum(mind, d)
        sel = sel.at[t].set(jnp.argmax(mind).astype(jnp.int32))
        return mind, sel

    _, sel = lax.fori_loop(1, n_sample, body, (mind0, sel0))
    return sel


def _fps_all(pos, counts, ratio):
    # counts: host-static per-graph node counts (batch assumed sorted/contiguous).
    counts = [int(c) for c in counts]
    starts, acc = [], 0
    for c in counts:
        starts.append(acc)
        acc += c
    parts = []
    for g, cnt in enumerate(counts):
        n_sample = max(1, int(math.ceil(ratio * cnt)))
        pos_g = lax.slice_in_dim(pos, starts[g], starts[g] + cnt, axis=0)
        parts.append(_fps_one(pos_g, n_sample) + starts[g])
    return jnp.concatenate(parts).astype(jnp.int32)


def _gather_neighbors(x, pos, pos_s, d2, r, sample_size):
    # keep the `sample_size` nearest in-radius neighbors of each sampled point
    # TODO(synk): fuse this top-K + gather into the distance kernel (running VMEM top-K,
    #             'arbitrary' n axis) to avoid the S x N HBM round trip for large N.
    n = pos.shape[0]
    k = min(sample_size, n)
    score = jnp.where(d2 <= jnp.float32(r * r), -d2, -jnp.inf)
    vals, nbr_idx = lax.top_k(score, k)
    valid = vals > -jnp.inf
    nbr_idx = jnp.where(valid, nbr_idx, 0).astype(jnp.int32)
    xg = x[nbr_idx]                                  # [S, K, F]
    rel = pos[nbr_idx] - pos_s[:, None, :]           # pos_j - pos_i
    return nbr_idx, valid, xg, rel


def _pad_params(params):
    """Pad hidden/output lane dims to multiples of 128; bf16 MXU operands, f32 biases."""
    w1, b1, w2, b2 = params
    h, c = w1.shape[1], w2.shape[1]
    hp, cp = _round_up(h, 128), _round_up(c, 128)
    w1p = jnp.pad(w1, ((0, 0), (0, hp - h))).astype(jnp.bfloat16)        # (F+3, Hp)
    b1p = jnp.pad(jnp.reshape(b1, (1, -1)), ((0, 0), (0, hp - h)))       # (1, Hp) f32
    w2p = jnp.pad(w2, ((0, hp - h), (0, cp - c))).astype(jnp.bfloat16)   # (Hp, Cp)
    b2p = jnp.pad(jnp.reshape(b2, (1, -1)), ((0, 0), (0, cp - c)))       # (1, Cp) f32
    return w1p, b1p, w2p, b2p


# ----------------------------------------------------------------------------
# Full forward (matches SAModule.forward)
# ----------------------------------------------------------------------------
def sa_module_forward(x, pos, batch, counts, params, *, sample_points, r, sample_size):
    n = pos.shape[0]
    idx = _fps_all(pos, counts, sample_points / n)                       # fps(...)
    pos_s, batch_s = pos[idx], batch[idx]                                # pos[idx], batch[idx]
    d2 = pairwise_dist2_pallas(pos_s, batch_s, pos, batch)               # radius(...) distances
    _, valid, xg, rel = _gather_neighbors(x, pos, pos_s, d2, r, sample_size)
    padded = _pad_params(params)
    x_out = point_conv_pallas(xg, rel, valid, padded, c_out=params[2].shape[1])  # PointConv
    return x_out, pos_s, batch_s


# ----------------------------------------------------------------------------
# Pure-JAX reference (for verification)
# ----------------------------------------------------------------------------
def _pairwise_dist2_ref(pos_s, batch_s, pos, batch):
    d2 = jnp.sum((pos_s[:, None, :] - pos[None, :, :]) ** 2, axis=-1)
    return jnp.where(batch_s[:, None] == batch[None, :], d2, jnp.float32(1e30))


def _pointconv_ref(x_nbr, rel, valid, params):
    w1, b1, w2, b2 = params
    feats = jnp.concatenate([x_nbr, rel], axis=-1)                      # cat([x_j, pos_j - pos_i])
    h = jnp.maximum(jnp.einsum('skf,fh->skh', feats, w1) + b1.reshape(1, 1, -1), 0.0)
    msg = jnp.einsum('skh,hc->skc', h, w2) + b2.reshape(1, 1, -1)
    msg = jnp.where(valid[:, :, None], msg, jnp.float32(-1e30))
    return jnp.max(msg, axis=1)                                         # max aggregation


def reference_forward(x, pos, batch, counts, params, *, sample_points, r, sample_size):
    n = pos.shape[0]
    idx = _fps_all(pos, counts, sample_points / n)
    pos_s, batch_s = pos[idx], batch[idx]
    d2 = _pairwise_dist2_ref(pos_s, batch_s, pos, batch)
    _, valid, xg, rel = _gather_neighbors(x, pos, pos_s, d2, r, sample_size)
    return _pointconv_ref(xg, rel, valid, params), pos_s, batch_s


# ----------------------------------------------------------------------------
if __name__ == "__main__":
    SAMPLE_POINTS, R, SAMPLE_SIZE = 6, 10.0, 16
    F, H, C = 4, 32, 16

    batch_np = np.array([0] * 9 + [1] * 7, dtype=np.int32)   # 2 graphs: 9 and 7 nodes
    N = batch_np.shape[0]
    counts = np.bincount(batch_np)

    key = jax.random.PRNGKey(0)
    ks = jax.random.split(key, 6)
    x = jax.random.normal(ks[0], (N, F), jnp.float32)
    pos = jax.random.normal(ks[1], (N, 3), jnp.float32)
    w1 = jax.random.normal(ks[2], (F + 3, H), jnp.float32) * 0.3
    b1 = jax.random.normal(ks[3], (1, H), jnp.float32) * 0.1
    w2 = jax.random.normal(ks[4], (H, C), jnp.float32) * 0.3
    b2 = jax.random.normal(ks[5], (1, C), jnp.float32) * 0.1
    params = (w1, b1, w2, b2)
    batch = jnp.asarray(batch_np)

    # --- full Pallas forward ---
    x_out, pos_out, batch_out = sa_module_forward(
        x, pos, batch, counts, params,
        sample_points=SAMPLE_POINTS, r=R, sample_size=SAMPLE_SIZE)
    jax.block_until_ready((x_out, pos_out, batch_out))

    # --- direct per-kernel checks ---
    d2_p = pairwise_dist2_pallas(pos[:5], batch[:5], pos, batch)
    d2_r = _pairwise_dist2_ref(pos[:5], batch[:5], pos, batch)
    np.testing.assert_allclose(np.asarray(d2_p), np.asarray(d2_r), rtol=1e-4, atol=1e-4)

    idx = _fps_all(pos, counts, SAMPLE_POINTS / N)
    pos_s = pos[idx]
    d2_full = _pairwise_dist2_ref(pos_s, batch[idx], pos, batch)
    _, valid, xg, rel = _gather_neighbors(x, pos, pos_s, d2_full, R, SAMPLE_SIZE)
    pc_p = point_conv_pallas(xg, rel, valid, _pad_params(params), c_out=C)
    pc_r = _pointconv_ref(xg, rel, valid, params)
    # bf16 MXU operands (f32 accumulation) -> compare against the f32 reference at ~bf16
    # precision instead of the old 1e-3 f32 tolerance.
    np.testing.assert_allclose(np.asarray(pc_p), np.asarray(pc_r), rtol=2e-2, atol=2e-2)

    # --- end-to-end check vs pure-JAX reference ---
    x_ref, pos_ref, batch_ref = reference_forward(
        x, pos, batch, counts, params,
        sample_points=SAMPLE_POINTS, r=R, sample_size=SAMPLE_SIZE)

    ratio = SAMPLE_POINTS / N
    S = sum(max(1, int(math.ceil(ratio * int(c)))) for c in counts)
    assert x_out.shape == (S, C)
    assert pos_out.shape == (S, 3)
    assert batch_out.shape == (S,)
    np.testing.assert_allclose(np.asarray(x_out), np.asarray(x_ref), rtol=2e-2, atol=2e-2)
    np.testing.assert_allclose(np.asarray(pos_out), np.asarray(pos_ref), rtol=1e-5, atol=1e-5)
    np.testing.assert_array_equal(np.asarray(batch_out), np.asarray(batch_ref))

    print("KERNEL_OK")
</pallas_src>

<mosaic_0001>
module attributes {stable_mosaic.version = 11 : i64} {
  func.func @_dist_kernel(%arg0: i32, %arg1: i32, %arg2: memref<8x3xf32, #tpu.memory_space<vmem>>, %arg3: memref<3x128xf32, #tpu.memory_space<vmem>>, %arg4: memref<8x1xi32, #tpu.memory_space<vmem>>, %arg5: memref<1x128xi32, #tpu.memory_space<vmem>>, %arg6: memref<8x128xf32, #tpu.memory_space<vmem>>) attributes {dimension_semantics = [#tpu.dimension_semantics<parallel>, #tpu.dimension_semantics<parallel>], iteration_bounds = array<i64: 1, 1>, scalar_prefetch = 0 : i64, scratch_operands = 0 : i64, tpu.core_type = #tpu.core_type<tc>, window_params = [{transform_indices = @transform_0, window_bounds = array<i64: 8, 3>}, {transform_indices = @transform_1, window_bounds = array<i64: 3, 128>}, {transform_indices = @transform_2, window_bounds = array<i64: 8, 1>}, {transform_indices = @transform_3, window_bounds = array<i64: 1, 128>}, {transform_indices = @transform_4, window_bounds = array<i64: 8, 128>}]} {
    %c0 = arith.constant 0 : index
    %c0_0 = arith.constant 0 : index
    %0 = vector.load %arg2[%c0, %c0_0] : memref<8x3xf32, #tpu.memory_space<vmem>>, vector<8x3xf32>
    %c0_1 = arith.constant 0 : index
    %c0_2 = arith.constant 0 : index
    %1 = vector.load %arg3[%c0_1, %c0_2] : memref<3x128xf32, #tpu.memory_space<vmem>>, vector<3x128xf32>
    %2 = vector.extract_strided_slice %0 {offsets = [0, 0], sizes = [8, 1], strides = [1, 1]} : vector<8x3xf32> to vector<8x1xf32>
    %3 = vector.extract_strided_slice %1 {offsets = [0, 0], sizes = [1, 128], strides = [1, 1]} : vector<3x128xf32> to vector<1x128xf32>
    %4 = vector.broadcast %2 : vector<8x1xf32> to vector<8x128xf32>
    %5 = vector.broadcast %3 : vector<1x128xf32> to vector<8x128xf32>
    %6 = arith.subf %4, %5 : vector<8x128xf32>
    %7 = vector.extract_strided_slice %0 {offsets = [0, 1], sizes = [8, 1], strides = [1, 1]} : vector<8x3xf32> to vector<8x1xf32>
    %8 = vector.extract_strided_slice %1 {offsets = [1, 0], sizes = [1, 128], strides = [1, 1]} : vector<3x128xf32> to vector<1x128xf32>
    %9 = vector.broadcast %7 : vector<8x1xf32> to vector<8x128xf32>
    %10 = vector.broadcast %8 : vector<1x128xf32> to vector<8x128xf32>
    %11 = arith.subf %9, %10 : vector<8x128xf32>
    %12 = vector.extract_strided_slice %0 {offsets = [0, 2], sizes = [8, 1], strides = [1, 1]} : vector<8x3xf32> to vector<8x1xf32>
    %13 = vector.extract_strided_slice %1 {offsets = [2, 0], sizes = [1, 128], strides = [1, 1]} : vector<3x128xf32> to vector<1x128xf32>
    %14 = vector.broadcast %12 : vector<8x1xf32> to vector<8x128xf32>
    %15 = vector.broadcast %13 : vector<1x128xf32> to vector<8x128xf32>
    %16 = arith.subf %14, %15 : vector<8x128xf32>
    %17 = arith.mulf %6, %6 : vector<8x128xf32>
    %18 = arith.mulf %11, %11 : vector<8x128xf32>
    %19 = arith.addf %17, %18 : vector<8x128xf32>
    %20 = arith.mulf %16, %16 : vector<8x128xf32>
    %21 = arith.addf %19, %20 : vector<8x128xf32>
    %c0_3 = arith.constant 0 : index
    %c0_4 = arith.constant 0 : index
    %22 = vector.load %arg4[%c0_3, %c0_4] : memref<8x1xi32, #tpu.memory_space<vmem>>, vector<8x1xi32>
    %c0_5 = arith.constant 0 : index
    %c0_6 = arith.constant 0 : index
    %23 = vector.load %arg5[%c0_5, %c0_6] : memref<1x128xi32, #tpu.memory_space<vmem>>, vector<1x128xi32>
    %24 = vector.broadcast %22 : vector<8x1xi32> to vector<8x128xi32>
    %25 = vector.broadcast %23 : vector<1x128xi32> to vector<8x128xi32>
    %26 = arith.cmpi eq, %24, %25 : vector<8x128xi32>
    %cst = arith.constant 1.000000e+30 : f32
    %27 = vector.broadcast %cst : f32 to vector<8x128xf32>
    %28 = arith.select %26, %21, %27 : vector<8x128xi1>, vector<8x128xf32>
    %c0_7 = arith.constant 0 : index
    %c0_8 = arith.constant 0 : index
    %29 = vector.load %arg6[%c0_7, %c0_8] : memref<8x128xf32, #tpu.memory_space<vmem>>, vector<8x128xf32>
    tpu.vector_store %arg6[%c0_7, %c0_8], %28 {strides = array<i32>} : memref<8x128xf32, #tpu.memory_space<vmem>>, vector<8x128xf32>,
    return
  }
  func.func @transform_0(%arg0: i32, %arg1: i32) -> (i32, i32) {
    %c0_i32 = arith.constant 0 : i32
    %c0_i32_0 = arith.constant 0 : i32
    return %arg0, %c0_i32 : i32, i32
  }
  func.func @transform_1(%arg0: i32, %arg1: i32) -> (i32, i32) {
    %c0_i32 = arith.constant 0 : i32
    %c0_i32_0 = arith.constant 0 : i32
    return %c0_i32, %arg1 : i32, i32
  }
  func.func @transform_2(%arg0: i32, %arg1: i32) -> (i32, i32) {
    %c0_i32 = arith.constant 0 : i32
    %c0_i32_0 = arith.constant 0 : i32
    return %arg0, %c0_i32 : i32, i32
  }
  func.func @transform_3(%arg0: i32, %arg1: i32) -> (i32, i32) {
    %c0_i32 = arith.constant 0 : i32
    %c0_i32_0 = arith.constant 0 : i32
    return %c0_i32, %arg1 : i32, i32
  }
  func.func @transform_4(%arg0: i32, %arg1: i32) -> (i32, i32) {
    %c0_i32 = arith.constant 0 : i32
    return %arg0, %arg1 : i32, i32
  }
}

</mosaic_0001>

<bundles_post_ra>
// kernel: tpu_custom_call.1
= control target key start
LH: loop header
LB: loop body
LE: loop exit
PB: predicated region body
PF: predicated region fallthrough
CT: control target
= control target key end

     0   :  { %v105_v1 = vmov 0   ;;  %v106_v2 = vmov 2   ;;  %s149_s0 = inlined_call_operand.vmem [shape: f32[8,3], index: 0, kind: input, shape index: {}]   ;;  %s150_s1 = inlined_call_operand.vmem [shape: f32[3,128], index: 1, kind: input, shape index: {}]   ;;  %s151_s2 = inlined_call_operand.vmem [shape: s32[8,1], index: 2, kind: input, shape index: {}]   ;;  %s152_s3 = inlined_call_operand.vmem [shape: s32[1,128], index: 3, kind: input, shape index: {}]   ;;  %s153_s4 = inlined_call_operand.hbm [shape: f32[8,128], index: 4, kind: output, shape index: {}]  }
   0x1   :  { %v18_v0 = vld [vmem:[%s149_s0] sm:$0xff]  ;;  %73 = vset.pattern.permute.xlu0 %v105_v1  ;;  %75 = vset.pattern.permute.xlu1 %v106_v2 }
   0x2   :  { %9 = vsyncpa [#allocation3], 0  ;;  %22 = vperm.xlu0 %73, %v18_v0   ;;  %34 = vperm.xlu1 %75, %v18_v0   ;;  %v44_v3 = vld [vmem:[%s151_s2] sm:$0xff]  ;;  %v107_v4 = vmov 1   ;;  %s108_s21 = smov [#allocation2]   ;;  %s60_s24 = sshll.u32 %s153_s4, 4  ;;  %s61_s24 = int_to_ptr.hbm [resolvable:$true] %s60_s24 }
   0x3   :  { %v19_v6 = vld [vmem:[%s150_s1] sm:$0x7]  ;;  %s58_s22 = sshll.u32 %s108_s21, 4  ;;  %s59_s22 = int_to_ptr.vmem [resolvable:$true] %s58_s22 }
   0x4   :  { %v25_v8 = vperm.slane %v19_v6, 0  ;;  %v37_v9 = vperm.slane %v19_v6, 2  ;;  %v31_v10 = vperm.slane %v19_v6, 1  ;;  %v78_v15 = vld [vmem:[%s152_s3] ss:$0 sm:$0xff] }
   0xa   :  { %74 = vset.pattern.permute.xlu0 %v107_v4  ;;  %76 = vset.pattern.permute.xlu1 %v105_v1 }
   0xb   :  { %28 = vperm.xlu0 %74, %v18_v0   ;;  %47 = vperm.xlu1 %76, %v44_v3  }
  0x13   :  { %77 = vset.pattern.permute.xlu0 %v105_v1 }
  0x74   :  { %v23_v5 = vpop.permute.xlu0 %22  ;;  %v35_v7 = vpop.permute.xlu1 %34 }
  0x75   :  { %v26_v11 = vsub.f32 %v23_v5, %v25_v8  ;;  %v38_v13 = vsub.f32 %v35_v7, %v37_v9 }
  0x77   :  { %v39_v16 = vmul.f32 %v26_v11, %v26_v11  ;;  %v42_v19 = vmul.f32 %v38_v13, %v38_v13 }
  0x7d   :  { %v29_v12 = vpop.permute.xlu0 %28  ;;  %v48_v18 = vpop.permute.xlu1 %47 }
  0x7e   :  { %v32_v14 = vsub.f32 %v29_v12, %v31_v10  ;;  %vm50_vm0 = vcmp.eq.s32.totalorder %v48_v18, %v78_v15 }
  0x80   :  { %v40_v17 = vmul.f32 %v32_v14, %v32_v14 }
  0x82   :  { %v41_v20 = vadd.f32 %v40_v17, %v39_v16 }
  0x84   :  { %v43_v21 = vadd.f32 %v42_v19, %v41_v20 }
  0x86   :  { %v51_v22 = vsel %vm50_vm0, %v43_v21, 1e+30 }
  0x87   :  { %52 = vst [vmem:[#allocation2] sm:$0xff] %v51_v22 }
  0x88   :  { %63 = dma.vmem_to_hbm [thread:$0]  %s59_s22, 128, %s61_s24, [#allocation3]  }
  0x89   :  { %103 = dma.done.wait [#allocation3], 128  }
  0x8a   :  { %104 = vsyncadd [#allocation3], 4294967168 }
  0x8b   :  { %68 = vsyncpa [#allocation3], 1 }

</bundles_post_ra>
